<compile_context>
chip_gen: v5e
topology: v5e:2x2
jax: 0.10.0
libtpu: 0.0.40
codegen_flags: <defaults>
</compile_context>

<pallas_src>
import jax
import jax.numpy as jnp
from jax.experimental import pallas as pl
from jax.experimental.pallas import tpu as pltpu


def channel_attention_kernel(x_ref, w1_ref, w2x2_ref, o_ref):
    # x_ref:    (nb, C, tp)   channels on sublanes, pixel tile on lanes
    # w1_ref:   (C//16, C)    first 1x1 conv weight (PyTorch (out, in) layout)
    # w2x2_ref: (C, C//16)    second 1x1 conv weight, pre-scaled by 2 (identity pools)
    # o_ref:    (nb, C, tp)
    w1 = w1_ref[...]
    w2 = w2x2_ref[...]
    nb = x_ref.shape[0]
    for n in range(nb):  # static unroll over the fused batch slab (nb is small)
        xn = x_ref[n]  # (C, tp) in storage dtype -> MXU fast path for bf16
        h = jnp.maximum(
            jnp.dot(w1, xn, preferred_element_type=jnp.float32), 0.0
        )
        y = jnp.dot(w2, h.astype(w2.dtype), preferred_element_type=jnp.float32)
        o_ref[n] = jax.nn.sigmoid(y).astype(o_ref.dtype)


def _vmem_capacity_bytes(default=64 << 20):
    """VMEM capacity of the current chip; fall back to the v7x-safe 64 MiB."""
    try:
        info = pltpu.get_tpu_info()
        cap = getattr(info, "vmem_capacity_bytes", None)
        if cap:
            return int(cap)
    except Exception:
        pass
    return default


def _choose_tiles(N, C, P, itemsize, vmem_bytes):
    """Pick (nb, tp) so a step moves ~0.5-2 MiB of activations and stays well
    inside VMEM (input+output blocks are double-buffered -> ~4 live copies)."""
    block_budget = max(128 * 1024, min(2 << 20, vmem_bytes // 16))
    per_pixel = C * itemsize
    tp_budget = max(1, block_budget // per_pixel)

    if P > 128 and tp_budget < P:
        # Tile the pixel dim only; tp must be a multiple of 128 (lane-dense).
        tp = max(128, (min(tp_budget, P) // 128) * 128)
        nb = 1
    else:
        # Whole image fits: fuse batches to raise per-step bytes.
        tp = P
        nb = max(1, min(N, block_budget // max(1, C * P * itemsize)))

    # v7x megacore: keep >= 2 grid steps when the problem allows it.
    steps = pl.cdiv(N, nb) * pl.cdiv(P, tp)
    if steps < 2:
        if nb > 1:
            nb = (N + 1) // 2
        elif tp == P and P >= 256:
            tp = max(128, ((P // 2) // 128) * 128)
    return nb, tp


def channel_attention(x, w1, w2):
    """x: (N, C, H, W) NCHW (native PyTorch layout, no transposes).
    w1: (C//16, C), w2: (C, C//16) -- squeezed 1x1 Conv2d weights.
    Output dtype follows x; pass bf16 x to halve HBM traffic (f32 accumulation
    is kept inside the kernel via preferred_element_type)."""
    N, C, H, W = x.shape
    hidden = w1.shape[0]
    assert w1.shape == (hidden, C)
    assert w2.shape == (C, hidden)

    P = H * W
    itemsize = jnp.dtype(x.dtype).itemsize
    vmem_bytes = _vmem_capacity_bytes()
    nb, tp = _choose_tiles(N, C, P, itemsize, vmem_bytes)
    grid = (pl.cdiv(N, nb), pl.cdiv(P, tp))

    x3 = x.reshape(N, C, P)  # free reshape: NCHW is already (N, C, H*W)-contiguous

    # One-time weight prep hoisted out of the kernel: storage dtype of x and the
    # fc(max_x)+fc(avg_x) == 2*fc(x) factor folded into w2 (exact: *2 is exact in fp).
    w1c = w1.astype(x.dtype)
    w2x2 = (w2.astype(jnp.float32) * 2.0).astype(x.dtype)

    cost = pl.CostEstimate(
        flops=4 * N * P * hidden * C,
        transcendentals=N * C * P,
        bytes_accessed=2 * N * C * P * itemsize + 2 * hidden * C * itemsize,
    )

    out = pl.pallas_call(
        channel_attention_kernel,
        out_shape=jax.ShapeDtypeStruct((N, C, P), x.dtype),
        grid_spec=pltpu.PrefetchScalarGridSpec(
            num_scalar_prefetch=0,
            grid=grid,
            in_specs=[
                pl.BlockSpec((nb, C, tp), lambda n, p: (n, 0, p)),
                # tiny resident weights, same block every step
                pl.BlockSpec((hidden, C), lambda n, p: (0, 0)),
                pl.BlockSpec((C, hidden), lambda n, p: (0, 0)),
            ],
            out_specs=pl.BlockSpec((nb, C, tp), lambda n, p: (n, 0, p)),
        ),
        compiler_params=pltpu.CompilerParams(
            dimension_semantics=("parallel", "parallel"),
            vmem_limit_bytes=min(int(vmem_bytes * 3 // 4), 100 << 20),
        ),
        cost_estimate=cost,
    )(x3, w1c, w2x2)

    return out.reshape(N, C, H, W)


def channel_attention_ref(x, w1, w2):
    # Pure-JAX reference of the PyTorch forward (NCHW throughout).
    N, C, H, W = x.shape
    xf = x.reshape(N, C, H * W).astype(jnp.float32)
    h = jnp.maximum(jnp.einsum("oc,ncp->nop", w1.astype(jnp.float32), xf), 0.0)
    y = jnp.einsum("co,nop->ncp", w2.astype(jnp.float32), h)
    out = jax.nn.sigmoid(y + y)  # fc(max_x) + fc(avg_x) with identity pools
    return out.reshape(N, C, H, W).astype(x.dtype)


if __name__ == "__main__":
    key = jax.random.PRNGKey(0)
    kx, k1, k2 = jax.random.split(key, 3)

    # Small shapes consistent with the module (inplanes >= 16 so inplanes//16 >= 1).
    N, C, H, W = 2, 32, 16, 16
    hidden = C // 16

    x = jax.random.normal(kx, (N, C, H, W), dtype=jnp.float32)
    # Conv2d weights are (out_ch, in_ch, 1, 1); kept in squeezed 2-D form.
    w1 = jax.random.normal(k1, (hidden, C), dtype=jnp.float32) * 0.1
    w2 = jax.random.normal(k2, (C, hidden), dtype=jnp.float32) * 0.1

    out = jax.block_until_ready(channel_attention(x, w1, w2))
    ref = channel_attention_ref(x, w1, w2)
    assert out.shape == (N, C, H, W)
    assert jnp.allclose(out, ref, atol=1e-5, rtol=1e-5), "f32 mismatch vs reference"

    # Ragged pixel count: P = 130 is not a multiple of 128; tp falls back to the
    # full pixel dim (block == full extent), no padding/asserts in the wrapper.
    N2, C2, H2, W2 = 1, 64, 10, 13
    hidden2 = C2 // 16
    x2 = jax.random.normal(kx, (N2, C2, H2, W2), dtype=jnp.float32)
    w1b = jax.random.normal(k1, (hidden2, C2), dtype=jnp.float32) * 0.1
    w2b = jax.random.normal(k2, (C2, hidden2), dtype=jnp.float32) * 0.1
    out2 = jax.block_until_ready(channel_attention(x2, w1b, w2b))
    ref2 = channel_attention_ref(x2, w1b, w2b)
    assert out2.shape == (N2, C2, H2, W2)
    assert jnp.allclose(out2, ref2, atol=1e-5, rtol=1e-5), "ragged mismatch vs reference"

    # bf16 I/O path (halved HBM bytes); bf16 MXU operands + f32 accumulation.
    xb = x.astype(jnp.bfloat16)
    outb = jax.block_until_ready(channel_attention(xb, w1, w2))
    refb = channel_attention_ref(xb, w1, w2)
    assert outb.dtype == jnp.bfloat16
    assert jnp.allclose(outb.astype(jnp.float32), refb.astype(jnp.float32),
                        atol=1e-2, rtol=1e-2), "bf16 mismatch vs reference"

    print("KERNEL_OK")
</pallas_src>

<mosaic_0001>
module attributes {stable_mosaic.version = 11 : i64} {
  func.func @channel_attention_kernel(%arg0: i32, %arg1: i32, %arg2: memref<1x32x256xf32, #tpu.memory_space<vmem>>, %arg3: memref<2x32xf32, #tpu.memory_space<vmem>>, %arg4: memref<32x2xf32, #tpu.memory_space<vmem>>, %arg5: memref<1x32x256xf32, #tpu.memory_space<vmem>>) attributes {dimension_semantics = [#tpu.dimension_semantics<parallel>, #tpu.dimension_semantics<parallel>], iteration_bounds = array<i64: 2, 1>, scalar_prefetch = 0 : i64, scratch_operands = 0 : i64, tpu.core_type = #tpu.core_type<tc>, window_params = [{transform_indices = @transform_0, window_bounds = array<i64: 1, 32, 256>}, {pipeline_mode = #tpu.pipeline_mode<synchronous>, transform_indices = @transform_1, window_bounds = array<i64: 2, 32>}, {pipeline_mode = #tpu.pipeline_mode<synchronous>, transform_indices = @transform_2, window_bounds = array<i64: 32, 2>}, {transform_indices = @transform_3, window_bounds = array<i64: 1, 32, 256>}]} {
    %c0 = arith.constant 0 : index
    %c0_0 = arith.constant 0 : index
    %0 = vector.load %arg3[%c0, %c0_0] : memref<2x32xf32, #tpu.memory_space<vmem>>, vector<2x32xf32>
    %c0_1 = arith.constant 0 : index
    %c0_2 = arith.constant 0 : index
    %1 = vector.load %arg4[%c0_1, %c0_2] : memref<32x2xf32, #tpu.memory_space<vmem>>, vector<32x2xf32>
    %c0_3 = arith.constant 0 : index
    %c0_4 = arith.constant 0 : index
    %c0_5 = arith.constant 0 : index
    %2 = vector.load %arg2[%c0_3, %c0_4, %c0_5] : memref<1x32x256xf32, #tpu.memory_space<vmem>>, vector<1x32x256xf32>
    %3 = vector.shape_cast %2 : vector<1x32x256xf32> to vector<32x256xf32>
    %cst = arith.constant dense<0.000000e+00> : vector<2x256xf32>
    %4 = tpu.matmul %0, %3, %cst {dimension_numbers = #tpu.dot_dimension_numbers<[1], [0], [0], [1], [0, 0, 1, 1], [], []>} : vector<2x32xf32>, vector<32x256xf32>, vector<2x256xf32> -> vector<2x256xf32>
    %cst_6 = arith.constant 0.000000e+00 : f32
    %5 = vector.broadcast %cst_6 : f32 to vector<2x256xf32>
    %6 = arith.maximumf %4, %5 : vector<2x256xf32>
    %cst_7 = arith.constant dense<0.000000e+00> : vector<32x256xf32>
    %7 = tpu.matmul %1, %6, %cst_7 {dimension_numbers = #tpu.dot_dimension_numbers<[1], [0], [0], [1], [0, 0, 1, 1], [], []>} : vector<32x2xf32>, vector<2x256xf32>, vector<32x256xf32> -> vector<32x256xf32>
    %8 = arith.negf %7 : vector<32x256xf32>
    %9 = math.exp %8 : vector<32x256xf32>
    %cst_8 = arith.constant 1.000000e+00 : f32
    %10 = vector.broadcast %cst_8 : f32 to vector<32x256xf32>
    %11 = arith.addf %10, %9 : vector<32x256xf32>
    %12 = arith.divf %10, %11 : vector<32x256xf32>
    %c0_9 = arith.constant 0 : index
    %c0_10 = arith.constant 0 : index
    %c0_11 = arith.constant 0 : index
    %13 = vector.load %arg5[%c0_9, %c0_10, %c0_11] : memref<1x32x256xf32, #tpu.memory_space<vmem>>, vector<1x32x256xf32>
    %14 = vector.shape_cast %13 : vector<1x32x256xf32> to vector<32x256xf32>
    %15 = vector.shape_cast %12 : vector<32x256xf32> to vector<1x32x256xf32>
    tpu.vector_store %arg5[%c0_9, %c0_10, %c0_11], %15 {strides = array<i32>} : memref<1x32x256xf32, #tpu.memory_space<vmem>>, vector<1x32x256xf32>,
    return
  }
  func.func @transform_0(%arg0: i32, %arg1: i32) -> (i32, i32, i32) {
    %c0_i32 = arith.constant 0 : i32
    %c0_i32_0 = arith.constant 0 : i32
    return %arg0, %c0_i32, %arg1 : i32, i32, i32
  }
  func.func @transform_1(%arg0: i32, %arg1: i32) -> (i32, i32) {
    %c0_i32 = arith.constant 0 : i32
    %c0_i32_0 = arith.constant 0 : i32
    %c0_i32_1 = arith.constant 0 : i32
    return %c0_i32, %c0_i32_0 : i32, i32
  }
  func.func @transform_2(%arg0: i32, %arg1: i32) -> (i32, i32) {
    %c0_i32 = arith.constant 0 : i32
    %c0_i32_0 = arith.constant 0 : i32
    %c0_i32_1 = arith.constant 0 : i32
    return %c0_i32, %c0_i32_0 : i32, i32
  }
  func.func @transform_3(%arg0: i32, %arg1: i32) -> (i32, i32, i32) {
    %c0_i32 = arith.constant 0 : i32
    %c0_i32_0 = arith.constant 0 : i32
    return %arg0, %c0_i32, %arg1 : i32, i32, i32
  }
}

</mosaic_0001>

<bundles_post_ra>
// kernel: tpu_custom_call.1
= control target key start
LH: loop header
LB: loop body
LE: loop exit
PB: predicated region body
PF: predicated region fallthrough
CT: control target
= control target key end

     0   :  { %8 = vsyncpa [#allocation3], 0  ;;  %s1095_s0 = inlined_call_operand.hbm [shape: f32[2,32,256], index: 0, kind: input, shape index: {}]   ;;  %s1096_s1 = inlined_call_operand.vmem [shape: f32[2,32], index: 1, kind: input, shape index: {}]   ;;  %s1097_s2 = inlined_call_operand.vmem [shape: f32[32,2], index: 2, kind: input, shape index: {}]   ;;  %s1098_s3 = inlined_call_operand.hbm [shape: f32[2,32,256], index: 3, kind: output, shape index: {}]  }
   0x1   :  { %10 = vsyncpa [#allocation3 + $0x1], 0 }
   0x2   :  { %11 = vsyncpa [#allocation4], 0 }
   0x3   :  { %13 = vsyncpa [#allocation4 + $0x1], 0  ;;  %s888_s12 = smov 0   ;;  %s890_s13 = smov 0  }
   0x4   :  { %s892_s14 = smov 0   ;;  %s894_s15 = smov 0  }
   0x5   :  { %s896_s16 = smov 0   ;;  %s898_s17 = smov 0  }
   0x6 LB: > { %s613_s18 = sadd.s32 4294967295, %s862_s17   ;;  %s614_s19 = sadd.s32 4294967294, %s862_s17   ;;  %s862_s17 = sphi %s898_s17, %s19_s17   ;;  %s858_s16 = sphi %s896_s16, %s1115_s16   ;;  %s854_s15 = sphi %s894_s15, %s1114_s15   ;;  %s850_s14 = sphi %s892_s14, %s1113_s14   ;;  %s846_s13 = sphi %s890_s13, %s1112_s13   ;;  %s842_s12 = sphi %s888_s12, %s1111_s12  }
   0x7   : > { %s31_s20 = sadd.s32 1, %s858_s16  ;;  %s40_s21 = sadd.s32 1, %s850_s14 }
   0x8   : > { %p33_p0 = scmp.ge.s32.totalorder %s31_s20, 2  ;;  %p47_p1 = scmp.ne.s32.totalorder %s850_s14, %s846_s13 }
   0x9   : > { %p48_p2 = scmp.eq.s32.totalorder %s862_s17, 0  ;;  %p53_p3 = scmp.ne.s32.totalorder %s846_s13, %s842_s12 }
   0xa   : > { %s1117_s20 = smov (%p33_p0, %s31_s20), 0  ;;  %p54_p5 = scmp.eq.s32.totalorder %s613_s18, 0 }
   0xb   : > { %p929_p4 = por %p48_p2, %p47_p1  ;;  %s35_s23 = ssub.s32 %s858_s16, %s1117_s20 }
   0xc   : > { %p121_p6 = scmp.eq.s32.totalorder %s613_s18, 1  ;;  %p38_p7 = scmp.eq.s32.totalorder %s35_s23, 0 }
   0xd   : > { %p935_p8 = por %p54_p5, %p53_p3  ;;  %p127_p10 = scmp.eq.s32.totalorder %s614_s19, 1 }
   0xe   : > { %p939_p9 = por %p121_p6, %p47_p1  ;;  %p616_p12 = scmp.ge.s32.totalorder %s862_s17, 2 }
   0xf   : > { %s944_s26 = scalar_select %p38_p7, %s850_s14, %s40_s21  }
  0x10   : > { %p946_p11 = por %p127_p10, %p53_p3  ;;  %p664_p13 = scmp.lt.s32.totalorder %s862_s17, 2 }
  0x11   : > { %s153_s28 = sand.u32 1, %s850_s14   ;;  %s648_s30 = sshll.u32 %s858_s16, 6 }
  0x12   : > { %s617_s29 = sshll.u32 %s153_s28, 6  ;;  %s164_s6 = scalar_lea.hbm %s1095_s0, %s648_s30 }
  0x13   : > { %s157_s7 = scalar_lea.vmem [#allocation2], %s617_s29  ;;  %s165_s9 = sshll.u32 %s164_s6, 4  ;;  %s166_s9 = int_to_ptr.hbm [resolvable:$true] %s165_s9 }
  0x14   : > { %s167_s8 = sshll.u32 %s157_s7, 4  ;;  %p657_p0 = pnand %p664_p13, %p929_p4  ;;  %s168_s8 = int_to_ptr.vmem [resolvable:$true] %s167_s8 }
  0x15   : > { %p620_p1 = scmp.ge.s32.totalorder %s862_s17, 1  ;;  %s154_s10 = scalar_lea.sflag [#allocation3], %s153_s28 }
  0x16   : > { %s864_s11 = smov 256   ;;  %s865_s18 = smov 16  }
  0x17   : > { %659 = dma.hbm_to_vmem [thread:$0]  (!%p657_p0), %s166_s9, 1024, %s168_s8, %s154_s10, %s864_s11, %s864_s11, %s865_s18  }
  0x18   : > { %p175_p2 = scmp.lt.s32.totalorder %s862_s17, 3 }
  0x1a   : > { %p176_p3 = pnand %p620_p1, %p175_p2 }
  0x1b   : > { %s962_s19 = sand.u32 (!%p176_p3), 1, %s846_s13  }
  0x1c   : > { %179 = sbr.rel (%p176_p3) target bundleno = 354 (0x162), region = 32  ;;  %s621_s21 = sshll.u32 (!%p176_p3), %s962_s19, 6 }
  0x1d   : > { %s182_s23 = scalar_lea.sflag (!%p176_p3), [#allocation3], %s962_s19  ;;  %s185_s22 = scalar_lea.vmem (!%p176_p3), [#allocation2], %s621_s21 }
  0x21   : > { %833 = dma.done.wait (%p935_p8), %s182_s23, 1024  }
  0x22   : > { %835 = vsyncadd (%p935_p8), %s182_s23, 4294966272  ;;  %v222_v0 = vld [vmem:[%s185_s22 + $0x30] sm:$0xff]  ;;  %v223_v1 = vld [vmem:[%s185_s22 + $0x38] sm:$0xff]  ;;  %vm224_vm0 = vcmask 261120   ;;  %vm283_vm1 = vcmask 1041408   ;;  %vm270_vm2 = vcmask 15360  }
  0x23   : > { %v220_v2 = vld [vmem:[%s185_s22 + $0x20] sm:$0xff]  ;;  %240 = vmatpush.msra.mxu0 %v222_v0  ;;  %260 = vmatpush.msra.mxu1 %v223_v1  ;;  %v221_v3 = vld [vmem:[%s185_s22 + $0x28] sm:$0xff]  ;;  %v218_v4 = vld [vmem:[%s185_s22 + $0x10] sm:$0xff]  ;;  %s1030_s10 = scalar_lea.vmem [#allocation5], %s621_s21  ;;  %s649_s11 = sshll.u32 %s854_s15, 6 }
  0x24   : > { %v219_v5 = vld [vmem:[%s185_s22 + $0x18] sm:$0xff]  ;;  %v216_v6 = vld [vmem:[%s185_s22] sm:$0xff]  ;;  %v217_v7 = vld [vmem:[%s185_s22 + $0x8] sm:$0xff]  ;;  %s522_s23 = scalar_lea.hbm %s1098_s3, %s649_s11  ;;  %s523_s15 = sshll.u32 %s1030_s10, 4  ;;  %s524_s15 = int_to_ptr.vmem [resolvable:$true] %s523_s15 }
  0x25   : > { %241 = vmatpush.msra.mxu0 %v220_v2  ;;  %261 = vmatpush.msra.mxu1 %v221_v3  ;;  %v211_v8 = vld [vmem:[%s1096_s1] sm:$0x3]  ;;  %v213_v13 = vld [vmem:[%s1097_s2 + $0x8] sm:$0xff]  ;;  %v214_v15 = vld [vmem:[%s1097_s2 + $0x10] sm:$0xff]  ;;  %s525_s22 = sshll.u32 %s522_s23, 4  ;;  %s509_s28 = scalar_lea.sflag [#allocation4], %s962_s19  ;;  %s526_s22 = int_to_ptr.hbm [resolvable:$true] %s525_s22 }
  0x26   : > { %v212_v14 = vld [vmem:[%s1097_s2] sm:$0xff]  ;;  %v215_v16 = vld [vmem:[%s1097_s2 + $0x18] sm:$0xff]  ;;  %s794_s29 = sshra.s32 %s526_s22, 4  ;;  %s800_s5 = scalar_lea.hbm %s1098_s3, 128  ;;  %s795_s29 = int_to_ptr.hbm [resolvable:$true] %s794_s29 }
  0x27   : > { %242 = vmatpush.msra.mxu0 %v218_v4  ;;  %262 = vmatpush.msra.mxu1 %v219_v5  ;;  %s796_s24 = scalar_lea.hbm %s795_s29, 64  ;;  %p801_p7 = scmp.lt.s32.totalorder %s795_s29, %s1098_s3 }
  0x28   : > { %p797_p4 = scmp.ne.s32.totalorder %s795_s29, %s796_s24  ;;  %p802_p8 = scmp.lt.s32.totalorder %s800_s5, %s796_s24 }
  0x29   : > { %243 = vmatpush.msra.mxu0 %v216_v6  ;;  %263 = vmatpush.msra.mxu1 %v217_v7 }
  0x2a   : > { %623 = vmatmul.msk.f32.vlgmr.msra.gmra.mxu0 %vm224_vm0, %v211_v8  ;;  %624 = vmatmul.msk.f32.vlgmr.msra.gmra.mxu1 %vm224_vm0, %v211_v8  ;;  %p798_p5 = pnand %p797_p4, %p939_p9  ;;  %p803_p10 = por %p802_p8, %p801_p7 }
  0x2c   : > { %p799_p6 = pneg %p798_p5 }
  0x2e   : > { %p804_p13 = pnand %p803_p10, %p799_p6 }
  0xa7   : > { %v245_v9 = vpop.f32.mrf.mxu0  ;;  %v265_v10 = vpop.f32.mrf.mxu1 }
  0xa8   : > { %v268_v11 = vmax.f32 %v245_v9, 0.0  ;;  %v269_v12 = vmax.f32 %v265_v10, 0.0 }
  0xaa   : > { %625 = vmatpush.msk.msrb.mxu0 %vm283_vm1, %v268_v11  ;;  %650 = vmatpush.msk.msra.mxu2 %vm283_vm1, %v268_v11 }
  0xab   : > { %630 = vmatpush.msk.msrb.mxu1 %vm283_vm1, %v269_v12  ;;  %651 = vmatpush.msk.msra.mxu3 %vm283_vm1, %v269_v12 }
  0xac   : > { %627 = vmatmul.msk.f32.vlgmr.msra.gmra.mxu2 %vm270_vm2, %v213_v13  ;;  %632 = vmatmul.msk.f32.vlgmr.msra.gmra.mxu3 %vm270_vm2, %v213_v13 }
  0xad   : > { %626 = vmatmul.msk.f32.vlgmr.msrb.gmra.mxu0 %vm270_vm2, %v212_v14  ;;  %631 = vmatmul.msk.f32.vlgmr.msrb.gmra.mxu1 %vm270_vm2, %v212_v14 }
  0xb4   : > { %628 = vmatmul.msk.f32.gmra.mxu2 %vm270_vm2, %v214_v15  ;;  %633 = vmatmul.msk.f32.gmra.mxu3 %vm270_vm2, %v214_v15 }
  0xbc   : > { %629 = vmatmul.msk.f32.gmra.mxu2 %vm270_vm2, %v215_v16  ;;  %634 = vmatmul.msk.f32.gmra.mxu3 %vm270_vm2, %v215_v16 }
 0x12a   : > { %v307_v17 = vpop.f32.mrf.mxu0  ;;  %v336_v18 = vpop.f32.mrf.mxu1 }
 0x12b   : > { %v635_v19 = vmul.f32 -1.442695, %v307_v17  ;;  %v636_v20 = vmul.f32 -1.442695, %v336_v18 }
 0x12d   : > { %718 = vpow2.f32 %v635_v19 }
 0x12e   : > { %720 = vpow2.f32 %v636_v20 }
 0x12f   : > { %v310_v21 = vpop.f32.mrf.mxu2  ;;  %v339_v22 = vpop.f32.mrf.mxu3 }
 0x130   : > { %v637_v23 = vmul.f32 -1.442695, %v310_v21  ;;  %v638_v24 = vmul.f32 -1.442695, %v339_v22 }
 0x132   : > { %722 = vpow2.f32 %v637_v23 }
 0x133   : > { %v719_v25 = vpop.eup %718  ;;  %724 = vpow2.f32 %v638_v24 }
 0x134   : > { %v721_v26 = vpop.eup %720  ;;  %v372_v27 = vadd.f32 1.0, %v719_v25 }
 0x135   : > { %v373_v28 = vadd.f32 1.0, %v721_v26 }
 0x136   : > { %726 = vrcp.f32 %v372_v27  ;;  %v389_v36 = vand.u32 2147483647, %v372_v27  ;;  %v391_v39 = vand.u32 2147483648, %v372_v27  ;;  %vm385_vm3 = vweird.f32 %v372_v27 }
 0x137   : > { %728 = vrcp.f32 %v373_v28  ;;  %v313_v29 = vpop.f32.mrf.mxu2  ;;  %v342_v30 = vpop.f32.mrf.mxu3  ;;  %v404_v42 = vand.u32 2147483647, %v373_v28  ;;  %vm400_vm4 = vweird.f32 %v373_v28  ;;  %v406_v44 = vand.u32 2147483648, %v373_v28 }
 0x138   : > { %v723_v31 = vpop.eup %722  ;;  %v639_v32 = vmul.f32 -1.442695, %v313_v29  ;;  %v640_v37 = vmul.f32 -1.442695, %v342_v30  ;;  %vm993_vm6 = vcmp.eq.f32.partialorder %v389_v36, 8.507059e+37  ;;  %v392_v50 = vor.u32 1.1754944e-38, %v391_v39 }
 0x139   : > { %v725_v33 = vpop.eup %724  ;;  %v987_v34 = vadd.f32 1.0, %v723_v31  ;;  %vm997_vm8 = vcmp.eq.f32.partialorder %v404_v42, 8.507059e+37  ;;  %v407_v62 = vor.u32 1.1754944e-38, %v406_v44 }
 0x13a   : > { %v989_v35 = vadd.f32 1.0, %v725_v33  ;;  %730 = vpow2.f32 %v639_v32 }
 0x13b   : > { %732 = vrcp.f32 %v987_v34  ;;  %v419_v63 = vand.u32 2147483647, %v987_v34  ;;  %v421_v4 = vand.u32 2147483648, %v987_v34  ;;  %vm415_vm13 = vweird.f32 %v987_v34 }
 0x13c   : > { %v727_v38 = vpop.eup %726  ;;  %734 = vrcp.f32 %v989_v35  ;;  %v434_v5 = vand.u32 2147483647, %v989_v35  ;;  %v436_v9 = vand.u32 2147483648, %v989_v35  ;;  %vm430_vm15 = vweird.f32 %v989_v35 }
 0x13d   : > { %v729_v40 = vpop.eup %728  ;;  %v381_v41 = vmul.f32 %v727_v38, %v372_v27  ;;  %vm386_vm5 = vweird.f32 %v727_v38  ;;  %736 = vpow2.f32 %v640_v37  ;;  %v422_v20 = vor.u32 1.1754944e-38, %v421_v4 }
 0x13e   : > { %v396_v43 = vmul.f32 %v729_v40, %v373_v28  ;;  %vm401_vm7 = vweird.f32 %v729_v40  ;;  %vm1006_vm9 = vmor %vm385_vm3, %vm386_vm5  ;;  %vm420_vm0 = vcmp.eq.f32.partialorder %v419_v63, 8.507059e+37  ;;  %v437_v23 = vor.u32 1.1754944e-38, %v436_v9 }
 0x13f   : > { %v382_v45 = vsub.f32 1.0, %v381_v41  ;;  %v316_v47 = vpop.f32.mrf.mxu2  ;;  %v345_v48 = vpop.f32.mrf.mxu3  ;;  %vm1014_vm10 = vmor %vm400_vm4, %vm401_vm7  ;;  %vm435_vm2 = vcmp.eq.f32.partialorder %v434_v5, 8.507059e+37 }
 0x140   : > { %v731_v49 = vpop.eup %730  ;;  %v397_v51 = vsub.f32 1.0, %v396_v43  ;;  %v641_v52 = vmul.f32 -1.442695, %v316_v47  ;;  %v642_v57 = vmul.f32 -1.442695, %v345_v48 }
 0x141   : > { %v733_v53 = vpop.eup %732  ;;  %v383_v54 = vmul.f32 %v727_v38, %v382_v45  ;;  %v1001_v56 = vadd.f32 1.0, %v731_v49 }
 0x142   : > { %v735_v58 = vpop.eup %734  ;;  %v411_v59 = vmul.f32 %v733_v53, %v987_v34  ;;  %v398_v61 = vmul.f32 %v729_v40, %v397_v51  ;;  %738 = vpow2.f32 %v641_v52  ;;  %vm416_vm11 = vweird.f32 %v733_v53 }
 0x143   : > { %v426_v0 = vmul.f32 %v735_v58, %v989_v35  ;;  %v384_v1 = vadd.f32 %v727_v38, %v383_v54  ;;  %740 = vrcp.f32 %v1001_v56  ;;  %v737_v7 = vpop.eup %736  ;;  %vm431_vm12 = vweird.f32 %v735_v58  ;;  %vm417_vm14 = vmor %vm415_vm13, %vm416_vm11 }
 0x144   : > { %v412_v3 = vsub.f32 1.0, %v411_v59  ;;  %v399_v6 = vadd.f32 %v729_v40, %v398_v61  ;;  %742 = vpow2.f32 %v642_v57  ;;  %v377_v16 = vadd.f32 1.0, %v737_v7  ;;  %vm432_vm1 = vmor %vm430_vm15, %vm431_vm12 }
 0x145   : > { %v427_v8 = vsub.f32 1.0, %v426_v0  ;;  %v388_v10 = vsel %vm1006_vm9, %v727_v38, %v384_v1  ;;  %v451_v32 = vand.u32 2147483648, %v1001_v56  ;;  %v449_v34 = vand.u32 2147483647, %v1001_v56 }
 0x146   : > { %v413_v11 = vmul.f32 %v733_v53, %v412_v3  ;;  %v393_v12 = vsel %vm993_vm6, %v392_v50, %v388_v10  ;;  %v403_v13 = vsel %vm1014_vm10, %v729_v40, %v399_v6  ;;  %744 = vrcp.f32 %v377_v16 }
 0x147   : > { %v428_v14 = vmul.f32 %v735_v58, %v427_v8  ;;  %500 = vst [vmem:[%s1030_s10] sm:$0xff] %v393_v12  ;;  %v408_v15 = vsel %vm997_vm8, %v407_v62, %v403_v13  ;;  %vm445_vm4 = vweird.f32 %v1001_v56  ;;  %v452_v38 = vor.u32 1.1754944e-38, %v451_v32 }
 0x148   : > { %v739_v17 = vpop.eup %738  ;;  %v414_v18 = vadd.f32 %v733_v53, %v413_v11  ;;  %501 = vst [vmem:[%s1030_s10 + $0x8] sm:$0xff] %v408_v15  ;;  %vm450_vm6 = vcmp.eq.f32.partialorder %v449_v34, 8.507059e+37  ;;  %v464_v41 = vand.u32 2147483647, %v377_v16  ;;  %v466_v44 = vand.u32 2147483648, %v377_v16 }
 0x149   : > { %v741_v19 = vpop.eup %740  ;;  %v429_v21 = vadd.f32 %v735_v58, %v428_v14  ;;  %v378_v28 = vadd.f32 1.0, %v739_v17  ;;  %vm460_vm8 = vweird.f32 %v377_v16 }
 0x14a   : > { %v418_v22 = vsel %vm417_vm14, %v733_v53, %v414_v18  ;;  %v441_v24 = vmul.f32 %v741_v19, %v1001_v56  ;;  %v743_v25 = vpop.eup %742  ;;  %vm446_vm3 = vweird.f32 %v741_v19  ;;  %vm465_vm9 = vcmp.eq.f32.partialorder %v464_v41, 8.507059e+37 }
 0x14b   : > { %v423_v26 = vsel %vm420_vm0, %v422_v20, %v418_v22  ;;  %v433_v27 = vsel %vm432_vm1, %v735_v58, %v429_v21  ;;  %v1041_v31 = vadd.f32 1.0, %v743_v25  ;;  %746 = vrcp.f32 %v378_v28  ;;  %vm447_vm5 = vmor %vm445_vm4, %vm446_vm3 }
 0x14c   : > { %502 = vst [vmem:[%s1030_s10 + $0x10] sm:$0xff] %v423_v26  ;;  %v438_v29 = vsel %vm435_vm2, %v437_v23, %v433_v27  ;;  %v442_v30 = vsub.f32 1.0, %v441_v24  ;;  %v745_v35 = vpop.eup %744  ;;  %v467_v51 = vor.u32 1.1754944e-38, %v466_v44  ;;  %v479_v52 = vand.u32 2147483647, %v378_v28 }
 0x14d   : > { %503 = vst [vmem:[%s1030_s10 + $0x18] sm:$0xff] %v438_v29  ;;  %748 = vrcp.f32 %v1041_v31  ;;  %v456_v37 = vmul.f32 %v745_v35, %v377_v16  ;;  %vm461_vm7 = vweird.f32 %v745_v35  ;;  %v481_v53 = vand.u32 2147483648, %v378_v28 }
 0x14e   : > { %v443_v33 = vmul.f32 %v741_v19, %v442_v30  ;;  %vm462_vm10 = vmor %vm460_vm8, %vm461_vm7  ;;  %v496_v57 = vand.u32 2147483648, %v1041_v31  ;;  %v494_v60 = vand.u32 2147483647, %v1041_v31  ;;  %vm475_vm13 = vweird.f32 %v378_v28 }
 0x14f   : > { %v457_v40 = vsub.f32 1.0, %v456_v37  ;;  %v482_v62 = vor.u32 1.1754944e-38, %v481_v53  ;;  %vm490_vm15 = vweird.f32 %v1041_v31  ;;  %vm480_vm0 = vcmp.eq.f32.partialorder %v479_v52, 8.507059e+37 }
 0x150   : > { %v444_v36 = vadd.f32 %v741_v19, %v443_v33  ;;  %v497_v1 = vor.u32 1.1754944e-38, %v496_v57  ;;  %vm495_vm2 = vcmp.eq.f32.partialorder %v494_v60, 8.507059e+37 }
 0x151   : > { %v747_v42 = vpop.eup %746  ;;  %v458_v46 = vmul.f32 %v745_v35, %v457_v40 }
 0x152   : > { %v448_v39 = vsel %vm447_vm5, %v741_v19, %v444_v36  ;;  %v471_v47 = vmul.f32 %v747_v42, %v378_v28  ;;  %vm476_vm11 = vweird.f32 %v747_v42 }
 0x153   : > { %v453_v43 = vsel %vm450_vm6, %v452_v38, %v448_v39  ;;  %v749_v45 = vpop.eup %748  ;;  %v459_v49 = vadd.f32 %v745_v35, %v458_v46  ;;  %vm477_vm14 = vmor %vm475_vm13, %vm476_vm11 }
 0x154   : > { %504 = vst [vmem:[%s1030_s10 + $0x20] sm:$0xff] %v453_v43  ;;  %v486_v48 = vmul.f32 %v749_v45, %v1041_v31  ;;  %v472_v50 = vsub.f32 1.0, %v471_v47  ;;  %vm491_vm12 = vweird.f32 %v749_v45 }
 0x155   : > { %v463_v55 = vsel %vm462_vm10, %v745_v35, %v459_v49  ;;  %vm492_vm1 = vmor %vm490_vm15, %vm491_vm12 }
 0x156   : > { %v487_v54 = vsub.f32 1.0, %v486_v48  ;;  %v473_v56 = vmul.f32 %v747_v42, %v472_v50  ;;  %v468_v58 = vsel %vm465_vm9, %v467_v51, %v463_v55 }
 0x157   : > { %505 = vst [vmem:[%s1030_s10 + $0x28] sm:$0xff] %v468_v58 }
 0x158   : > { %v488_v59 = vmul.f32 %v749_v45, %v487_v54  ;;  %v474_v61 = vadd.f32 %v747_v42, %v473_v56 }
 0x15a   : > { %v489_v63 = vadd.f32 %v749_v45, %v488_v59  ;;  %v478_v0 = vsel %vm477_vm14, %v747_v42, %v474_v61 }
 0x15b   : > { %v483_v2 = vsel %vm480_vm0, %v482_v62, %v478_v0 }
 0x15c   : > { %v493_v3 = vsel %vm492_vm1, %v749_v45, %v489_v63  ;;  %506 = vst [vmem:[%s1030_s10 + $0x30] sm:$0xff] %v483_v2 }
 0x15d   : > { %v498_v4 = vsel %vm495_vm2, %v497_v1, %v493_v3 }
 0x15e   : > { %507 = vst [vmem:[%s1030_s10 + $0x38] sm:$0xff] %v498_v4 }
 0x15f   : > { %807 = shalt.err (!%p804_p13)
}
 0x160   : > { %s866_s19 = smov 256   ;;  %s867_s8 = smov 16  }
 0x161   : > { %654 = dma.vmem_to_hbm [thread:$0]  (%p939_p9), %s524_s15, 1024, %s526_s22, %s509_s28, %s866_s19, %s866_s19, %s867_s8  }
 0x162 PF: > { %s540_s9 = sand.u32 1, %s842_s12   ;;  %p661_p0 = pnand %p616_p12, %p946_p11 }
 0x163   : > { %s541_s10 = scalar_lea.sflag [#allocation4], %s540_s9 }
 0x164   : > { %p662_p1 = pneg %p661_p0 }
 0x166   : > { %837 = dma.done.wait (%p662_p1), %s541_s10, 1024  }
 0x167   : > { %839 = vsyncadd (%p662_p1), %s541_s10, 4294966272  ;;  %s19_s17 = sadd.s32 1, %s862_s17   ;;  %s1111_s12 = smov %s846_s13 }
 0x168   : > { %p16_p2 = scmp.ge.s32.totalorder %s19_s17, 4   ;;  %s1112_s13 = smov %s850_s14 }
 0x169   : > { %s1113_s14 = smov %s944_s26  ;;  %s1114_s15 = smov %s858_s16 }
 0x16a   : > { %s1115_s16 = smov %s1117_s20  ;;  %18 = sbr.rel (!%p16_p2) target bundleno = 6 (0x6), region = 77 }
 0x16f   :  { %547 = vsyncpa [#allocation3], 1 }
 0x170   :  { %549 = vsyncpa [#allocation3 + $0x1], 1 }
 0x171   :  { %550 = vsyncpa [#allocation4], 1 }
 0x172   :  { %552 = vsyncpa [#allocation4 + $0x1], 1 }

</bundles_post_ra>
